<compile_context>
chip_gen: v7x
topology: tpu7x:2x2x1
jax: 0.10.0
libtpu: 0.0.40
codegen_flags: <defaults>
</compile_context>

<pallas_src>
import functools

import jax
import jax.numpy as jnp
from jax.experimental import pallas as pl
from jax.experimental.pallas import tpu as pltpu

_LANE = 128     # vreg lane width: pad last dims to a multiple of this
_SUBLANE = 8    # f32 sublane count: batch tile must be a multiple of this


def _round_up(x, m):
    return (x + m - 1) // m * m


def mlp_kernel(x_ref, w1_ref, b1_ref, w2_ref, b2_ref, o_ref):
    # Layer 1 on the MXU: bf16 operands, f32 accumulation.
    h = jnp.dot(x_ref[...], w1_ref[...], preferred_element_type=jnp.float32)
    # Bias + ReLU epilogue in f32 (post-accumulation).
    h = jnp.maximum(h + b1_ref[...], 0.0)
    # Layer 2: cast activation to bf16 for the MXU, accumulate in f32.
    out = jnp.dot(h.astype(w2_ref.dtype), w2_ref[...],
                  preferred_element_type=jnp.float32)
    o_ref[...] = (out + b2_ref[...]).astype(o_ref.dtype)


def neural_net_forward(x, w1, b1, w2, b2, *, block_batch=256,
                       compute_dtype=jnp.bfloat16):
    """Forward pass of Linear(in, hidden) -> ReLU -> Linear(hidden, classes).

    x:  [B, in_size]
    w1: [in_size, hidden]   (pre-transposed vs. torch nn.Linear.weight)
    b1: [hidden]
    w2: [hidden, classes]
    b2: [classes]
    returns [B, classes] in x.dtype
    """
    B, in_size = x.shape
    hidden = w1.shape[1]
    classes = w2.shape[1]
    out_dtype = x.dtype

    # Lane-dense padding of the matmul dims.
    in_p = _round_up(in_size, _LANE)
    hid_p = _round_up(hidden, _LANE)
    cls_p = _round_up(classes, _LANE)

    # Batch tile: large 8-aligned tile; pad the batch so the grid divides evenly.
    bm = _round_up(min(block_batch, _round_up(B, _SUBLANE)), _SUBLANE)
    B_p = _round_up(B, bm)
    grid = (B_p // bm,)

    # Zero padding is an exact no-op for matmul / bias / ReLU: padded input cols hit
    # zero weights, padded hidden units are ReLU(0)=0 feeding zero w2 rows, and
    # padded output columns / batch rows are sliced off below.
    xp = jnp.pad(x.astype(compute_dtype), ((0, B_p - B), (0, in_p - in_size)))
    w1p = jnp.pad(w1.astype(compute_dtype), ((0, in_p - in_size), (0, hid_p - hidden)))
    b1p = jnp.pad(b1.astype(jnp.float32), (0, hid_p - hidden)).reshape(1, hid_p)
    w2p = jnp.pad(w2.astype(compute_dtype), ((0, hid_p - hidden), (0, cls_p - classes)))
    b2p = jnp.pad(b2.astype(jnp.float32), (0, cls_p - classes)).reshape(1, cls_p)

    # Resident operands (constant index_map) only need a single VMEM buffer.
    resident = functools.partial(pl.BlockSpec, pipeline_mode=pl.Buffered(1))

    w_bytes = jnp.dtype(compute_dtype).itemsize
    cost = pl.CostEstimate(
        flops=2 * B_p * (in_p * hid_p + hid_p * cls_p),
        transcendentals=0,
        bytes_accessed=(xp.size * w_bytes + w1p.size * w_bytes + w2p.size * w_bytes
                        + b1p.size * 4 + b2p.size * 4
                        + B_p * cls_p * jnp.dtype(out_dtype).itemsize),
    )

    # TODO(synk): if in_size/hidden grow to real-model sizes, add a K-reduction
    # grid axis (last, "arbitrary") with a VMEM f32 accumulator instead of keeping
    # the full weights resident.
    out = pl.pallas_call(
        mlp_kernel,
        out_shape=jax.ShapeDtypeStruct((B_p, cls_p), out_dtype),
        grid_spec=pltpu.PrefetchScalarGridSpec(
            num_scalar_prefetch=0,
            grid=grid,
            in_specs=[
                pl.BlockSpec((bm, in_p), lambda i: (i, 0)),   # x tile (double-buffered)
                resident((in_p, hid_p), lambda i: (0, 0)),    # w1 (resident, 1 buffer)
                resident((1, hid_p), lambda i: (0, 0)),       # b1
                resident((hid_p, cls_p), lambda i: (0, 0)),   # w2 (resident, 1 buffer)
                resident((1, cls_p), lambda i: (0, 0)),       # b2
            ],
            out_specs=pl.BlockSpec((bm, cls_p), lambda i: (i, 0)),
        ),
        compiler_params=pltpu.CompilerParams(
            dimension_semantics=("parallel",),      # batch tiles shard across v7x's 2 TCs
            vmem_limit_bytes=32 * 1024 * 1024,
        ),
        cost_estimate=cost,
    )(xp, w1p, b1p, w2p, b2p)

    return out[:B, :classes]


def _init_linear(key, in_features, out_features, dtype=jnp.float32):
    # PyTorch nn.Linear default: U(-1/sqrt(fan_in), 1/sqrt(fan_in)),
    # stored as [in_features, out_features] (already transposed for x @ W).
    kw, kb = jax.random.split(key)
    bound = 1.0 / (in_features ** 0.5)
    w = jax.random.uniform(kw, (in_features, out_features), dtype,
                           minval=-bound, maxval=bound)
    b = jax.random.uniform(kb, (out_features,), dtype,
                           minval=-bound, maxval=bound)
    return w, b


if __name__ == "__main__":
    key = jax.random.PRNGKey(0)
    k_x, k_l1, k_l2 = jax.random.split(key, 3)

    batch = 30          # deliberately not a multiple of 8 to exercise batch padding
    input_size = 32
    hidden_size = 64
    num_classes = 16

    x = jax.random.normal(k_x, (batch, input_size), jnp.float32)
    w1, b1 = _init_linear(k_l1, input_size, hidden_size)
    w2, b2 = _init_linear(k_l2, hidden_size, num_classes)

    # block_batch=8 only to exercise a multi-step grid at toy sizes;
    # the default (256) is the right choice for real batch sizes.
    out = neural_net_forward(x, w1, b1, w2, b2, block_batch=8)
    out = jax.block_until_ready(out)

    # Pure-JAX f32 reference of the PyTorch forward.  The kernel uses bf16 MXU
    # operands with f32 accumulation, so compare at bf16-level tolerance.
    ref = jnp.maximum(x @ w1 + b1, 0.0) @ w2 + b2
    assert out.shape == (batch, num_classes)
    assert jnp.allclose(out, ref, atol=2e-2, rtol=2e-2), \
        float(jnp.max(jnp.abs(out - ref)))

    print("KERNEL_OK")
</pallas_src>

<mosaic_0001>
module attributes {stable_mosaic.version = 11 : i64} {
  func.func @mlp_kernel(%arg0: i32, %arg1: memref<8x128xbf16, #tpu.memory_space<vmem>>, %arg2: memref<128x128xbf16, #tpu.memory_space<vmem>>, %arg3: memref<1x128xf32, #tpu.memory_space<vmem>>, %arg4: memref<128x128xbf16, #tpu.memory_space<vmem>>, %arg5: memref<1x128xf32, #tpu.memory_space<vmem>>, %arg6: memref<8x128xf32, #tpu.memory_space<vmem>>) attributes {dimension_semantics = [#tpu.dimension_semantics<parallel>], iteration_bounds = array<i64: 4>, scalar_prefetch = 0 : i64, scratch_operands = 0 : i64, tpu.core_type = #tpu.core_type<tc>, window_params = [{transform_indices = @transform_0, window_bounds = array<i64: 8, 128>}, {pipeline_mode = #tpu.pipeline_mode<synchronous>, transform_indices = @transform_1, window_bounds = array<i64: 128, 128>}, {pipeline_mode = #tpu.pipeline_mode<synchronous>, transform_indices = @transform_2, window_bounds = array<i64: 1, 128>}, {pipeline_mode = #tpu.pipeline_mode<synchronous>, transform_indices = @transform_3, window_bounds = array<i64: 128, 128>}, {pipeline_mode = #tpu.pipeline_mode<synchronous>, transform_indices = @transform_4, window_bounds = array<i64: 1, 128>}, {transform_indices = @transform_5, window_bounds = array<i64: 8, 128>}]} {
    %c0 = arith.constant 0 : index
    %c0_0 = arith.constant 0 : index
    %0 = vector.load %arg1[%c0, %c0_0] : memref<8x128xbf16, #tpu.memory_space<vmem>>, vector<8x128xbf16>
    %c0_1 = arith.constant 0 : index
    %c0_2 = arith.constant 0 : index
    %1 = vector.load %arg2[%c0_1, %c0_2] : memref<128x128xbf16, #tpu.memory_space<vmem>>, vector<128x128xbf16>
    %cst = arith.constant dense<0.000000e+00> : vector<8x128xf32>
    %2 = tpu.matmul %0, %1, %cst {dimension_numbers = #tpu.dot_dimension_numbers<[1], [0], [0], [1], [0, 0, 1, 1], [], []>} : vector<8x128xbf16>, vector<128x128xbf16>, vector<8x128xf32> -> vector<8x128xf32>
    %c0_3 = arith.constant 0 : index
    %c0_4 = arith.constant 0 : index
    %3 = vector.load %arg3[%c0_3, %c0_4] : memref<1x128xf32, #tpu.memory_space<vmem>>, vector<1x128xf32>
    %4 = vector.broadcast %3 : vector<1x128xf32> to vector<8x128xf32>
    %5 = arith.addf %2, %4 : vector<8x128xf32>
    %cst_5 = arith.constant 0.000000e+00 : f32
    %6 = vector.broadcast %cst_5 : f32 to vector<8x128xf32>
    %7 = arith.maximumf %5, %6 : vector<8x128xf32>
    %8 = arith.truncf %7 : vector<8x128xf32> to vector<8x128xbf16>
    %c0_6 = arith.constant 0 : index
    %c0_7 = arith.constant 0 : index
    %9 = vector.load %arg4[%c0_6, %c0_7] : memref<128x128xbf16, #tpu.memory_space<vmem>>, vector<128x128xbf16>
    %cst_8 = arith.constant dense<0.000000e+00> : vector<8x128xf32>
    %10 = tpu.matmul %8, %9, %cst_8 {dimension_numbers = #tpu.dot_dimension_numbers<[1], [0], [0], [1], [0, 0, 1, 1], [], []>} : vector<8x128xbf16>, vector<128x128xbf16>, vector<8x128xf32> -> vector<8x128xf32>
    %c0_9 = arith.constant 0 : index
    %c0_10 = arith.constant 0 : index
    %11 = vector.load %arg5[%c0_9, %c0_10] : memref<1x128xf32, #tpu.memory_space<vmem>>, vector<1x128xf32>
    %12 = vector.broadcast %11 : vector<1x128xf32> to vector<8x128xf32>
    %13 = arith.addf %10, %12 : vector<8x128xf32>
    %c0_11 = arith.constant 0 : index
    %c0_12 = arith.constant 0 : index
    %14 = vector.load %arg6[%c0_11, %c0_12] : memref<8x128xf32, #tpu.memory_space<vmem>>, vector<8x128xf32>
    tpu.vector_store %arg6[%c0_11, %c0_12], %13 {strides = array<i32>} : memref<8x128xf32, #tpu.memory_space<vmem>>, vector<8x128xf32>,
    return
  }
  func.func @transform_0(%arg0: i32) -> (i32, i32) {
    %c0_i32 = arith.constant 0 : i32
    %c0_i32_0 = arith.constant 0 : i32
    return %arg0, %c0_i32 : i32, i32
  }
  func.func @transform_1(%arg0: i32) -> (i32, i32) {
    %c0_i32 = arith.constant 0 : i32
    %c0_i32_0 = arith.constant 0 : i32
    %c0_i32_1 = arith.constant 0 : i32
    return %c0_i32, %c0_i32_0 : i32, i32
  }
  func.func @transform_2(%arg0: i32) -> (i32, i32) {
    %c0_i32 = arith.constant 0 : i32
    %c0_i32_0 = arith.constant 0 : i32
    %c0_i32_1 = arith.constant 0 : i32
    return %c0_i32, %c0_i32_0 : i32, i32
  }
  func.func @transform_3(%arg0: i32) -> (i32, i32) {
    %c0_i32 = arith.constant 0 : i32
    %c0_i32_0 = arith.constant 0 : i32
    %c0_i32_1 = arith.constant 0 : i32
    return %c0_i32, %c0_i32_0 : i32, i32
  }
  func.func @transform_4(%arg0: i32) -> (i32, i32) {
    %c0_i32 = arith.constant 0 : i32
    %c0_i32_0 = arith.constant 0 : i32
    %c0_i32_1 = arith.constant 0 : i32
    return %c0_i32, %c0_i32_0 : i32, i32
  }
  func.func @transform_5(%arg0: i32) -> (i32, i32) {
    %c0_i32 = arith.constant 0 : i32
    %c0_i32_0 = arith.constant 0 : i32
    return %arg0, %c0_i32 : i32, i32
  }
}

</mosaic_0001>

<bundles_post_ra>
// kernel: tpu_custom_call.1
= control target key start
LH: loop header
LB: loop body
LE: loop exit
PB: predicated region body
PF: predicated region fallthrough
CT: control target
= control target key end

     0   :  { %10 = vsyncpa [#allocation3], 0  ;;  %s1204_s0 = inlined_call_operand.hbm [shape: bf16[32,128], index: 0, kind: input, shape index: {}]   ;;  %s1205_s1 = inlined_call_operand.hbm [shape: bf16[128,128], index: 1, kind: input, shape index: {}]   ;;  %s1206_s2 = inlined_call_operand.vmem [shape: f32[1,128], index: 2, kind: input, shape index: {}]   ;;  %s1207_s3 = inlined_call_operand.hbm [shape: bf16[128,128], index: 3, kind: input, shape index: {}]   ;;  %s1208_s4 = inlined_call_operand.vmem [shape: f32[1,128], index: 4, kind: input, shape index: {}]   ;;  %s1209_s5 = inlined_call_operand.hbm [shape: f32[32,128], index: 5, kind: output, shape index: {}]  }
   0x1   :  { %12 = vsyncpa [#allocation3 + $0x1], 0 }
   0x2   :  { %13 = vsyncpa [#allocation6], 0 }
   0x3   :  { %14 = vsyncpa [#allocation4], 0 }
   0x4   :  { %16 = vsyncpa [#allocation4 + $0x1], 0  ;;  %s974_s18 = smov 0   ;;  %s976_s19 = smov 0  }
   0x5   :  { %s978_s20 = smov 0   ;;  %s980_s21 = smov 0  }
   0x6 LB: > { %s995_s22 = sadd.s32 4294967295, %s934_s21   ;;  %s599_s23 = sadd.s32 4294967294, %s934_s21   ;;  %s934_s21 = sphi %s980_s21, %s1228_s21   ;;  %s930_s20 = sphi %s978_s20, %s1227_s20   ;;  %s926_s19 = sphi %s976_s19, %s1226_s19   ;;  %s922_s18 = sphi %s974_s18, %s1225_s18  }
   0x7   : > { %p42_p0 = scmp.ne.s32.totalorder %s926_s19, %s922_s18  ;;  %p1210_p1 = scmp.eq.s32.totalorder %s995_s22, 0 }
   0x8   : > { %p156_p3 = scmp.eq.s32.totalorder %s599_s23, 3  ;;  %p600_p5 = scmp.ge.s32.totalorder %s934_s21, 1 }
   0x9   : > { %p1004_p4 = por %p1210_p1, %p42_p0  ;;  %p163_p7 = scmp.lt.s32.totalorder %s934_s21, 5 }
   0xa   : > { %p1009_p6 = por %p156_p3, %p42_p0  ;;  %s936_s27 = smov [#allocation5]  }
   0xb   : > { %s1213_s24 = scalar_select %p1004_p4, 1, 0 }
   0xc   : > { %s1214_s25 = scalar_select %p1009_p6, 1, 0 }
   0xd   : > { %p1014_p8 = pnand %p600_p5, %p163_p7  ;;  %s175_s28 = sshll.u32 %s936_s27, 4  ;;  %s176_s28 = int_to_ptr.vmem [resolvable:$true] %s175_s28 }
   0xe   : > { %s937_s30 = smov [#allocation7]   ;;  %s778_s9 = scalar_lea.hbm %s1205_s1, 1024 }
   0xf   : > { %s1215_s26 = scalar_select %p1014_p8, 1, 0 }
  0x10   : > { %p703_p9 = pneg %p1014_p8  ;;  %s191_s6 = sshll.u32 %s937_s30, 4  ;;  %s1026_s6 = int_to_ptr.vmem [resolvable:$true] %s191_s6 }
  0x11   : > { %p779_p11 = scmp.ne.s32.totalorder %s1205_s1, %s778_s9  ;;  %p785_p3 = scmp.lt.u32.totalorder %s778_s9, %s1205_s1 }
  0x12   : > { %p1022_p10 = pnand %p703_p9, %p1210_p1 }
  0x14   : > { %p780_p12 = pneg %p1022_p10 }
  0x16   : > { %p781_p13 = pnand %p780_p12, %p779_p11 }
  0x18   : > { %p782_p0 = pneg %p781_p13 }
  0x1a   : > { %p787_p5 = pnand %p785_p3, %p782_p0 }
  0x1c   : > { %790 = shalt.err (!%p787_p5)
}
  0x1d   : > { %s791_s14 = scalar_lea.vmem %s176_s28, 1024  ;;  %p799_p2 = scmp.lt.s32.totalorder %s176_s28, %s176_s28 }
  0x1e   : > { %p792_p7 = scmp.ne.s32.totalorder %s176_s28, %s791_s14  ;;  %p800_p6 = scmp.lt.s32.totalorder %s791_s14, %s791_s14 }
  0x20   : > { %p794_p9 = pnand %p792_p7, %p780_p12  ;;  %p801_p4 = por %p800_p6, %p799_p2 }
  0x22   : > { %p795_p1 = pneg %p794_p9 }
  0x24   : > { %p802_p8 = pnand %p801_p4, %p795_p1 }
  0x26   : > { %805 = shalt.err (!%p802_p8)
}
  0x27   : > { %s938_s15 = smov 64   ;;  %s939_s16 = smov 4  }
  0x28   : > { %706 = dma.hbm_to_vmem [thread:$0]  (!%p1022_p10), %s1205_s1, 1024, %s176_s28, [#allocation6], %s938_s15, %s938_s15, %s939_s16  }
  0x29   : > { %s806_s7 = scalar_lea.hbm %s1207_s3, 1024 }
  0x2a   : > { %p807_p11 = scmp.ne.s32.totalorder %s1207_s3, %s806_s7  ;;  %p813_p4 = scmp.lt.u32.totalorder %s806_s7, %s1207_s3 }
  0x2c   : > { %p809_p1 = pnand %p807_p11, %p780_p12 }
  0x2e   : > { %p810_p2 = pneg %p809_p1 }
  0x30   : > { %p815_p6 = pnand %p813_p4, %p810_p2 }
  0x32   : > { %818 = shalt.err (!%p815_p6)
}
  0x33   : > { %s819_s28 = scalar_lea.vmem %s1026_s6, 1024  ;;  %p827_p3 = scmp.lt.s32.totalorder %s1026_s6, %s1026_s6 }
  0x34   : > { %p820_p8 = scmp.ne.s32.totalorder %s1026_s6, %s819_s28  ;;  %p828_p5 = scmp.lt.s32.totalorder %s819_s28, %s819_s28 }
  0x36   : > { %p822_p13 = pnand %p820_p8, %p780_p12  ;;  %p829_p7 = por %p828_p5, %p827_p3 }
  0x38   : > { %p823_p0 = pneg %p822_p13 }
  0x3a   : > { %p830_p9 = pnand %p829_p7, %p823_p0 }
  0x3c   : > { %833 = shalt.err (!%p830_p9)
}
  0x3d   : > { %709 = dma.hbm_to_vmem [thread:$0]  (!%p1022_p10), %s1207_s3, 1024, %s1026_s6, [#allocation6], %s938_s15, %s938_s15, %s939_s16  }
  0x3e   : > { %s1076_s14 = sadd.s32 1, %s934_s21   ;;  %s29_s29 = sadd.s32 1, %s930_s20 }
  0x3f   : > { %s26_s17 = ssub.s32 %s934_s21, %s1076_s14  ;;  %p36_p12 = scmp.ne.s32.totalorder %s930_s20, %s926_s19 }
  0x40   : > { %p27_p11 = scmp.eq.s32.totalorder %s26_s17, 0  ;;  %p37_p1 = scmp.eq.s32.totalorder %s934_s21, 0 }
  0x41   : > { %p1217_p2 = scmp.eq.s32.totalorder %s995_s22, 3  ;;  %p720_p6 = scmp.lt.s32.totalorder %s934_s21, 4 }
  0x42   : > { %s1092_s27 = scalar_select %p27_p11, %s930_s20, %s29_s29  }
  0x43   : > { %p1086_p4 = por %p1217_p2, %p36_p12  ;;  %p38_p8 = por %p37_p1, %p36_p12 }
  0x44   : > { %s208_s30 = sand.u32 1, %s930_s20   ;;  %s605_s6 = sshll.u32 %s934_s21, 6 }
  0x45   : > { %s604_s7 = sshll.u32 %s208_s30, 2  ;;  %s1099_s8 = scalar_lea.hbm %s1204_s0, %s605_s6 }
  0x46   : > { %s212_s9 = scalar_lea.vmem [#allocation2], %s604_s7  ;;  %p1103_p10 = pnand %p720_p6, %p38_p8 }
  0x47   : > { %s219_s10 = sshll.u32 %s212_s9, 4  ;;  %s209_s28 = scalar_lea.sflag [#allocation3], %s208_s30  ;;  %s1101_s10 = int_to_ptr.vmem [resolvable:$true] %s219_s10 }
  0x48   : > { %s834_s12 = scalar_lea.hbm %s1099_s8, 64  ;;  %p836_p0 = pneg %p1103_p10 }
  0x49   : > { %p835_p13 = scmp.ne.s32.totalorder %s1099_s8, %s834_s12  ;;  %s839_s17 = scalar_lea.hbm %s1204_s0, 256 }
  0x4a   : > { %p840_p7 = scmp.lt.u32.totalorder %s1099_s8, %s1204_s0  ;;  %p841_p9 = scmp.lt.u32.totalorder %s839_s17, %s834_s12 }
  0x4b   : > { %p837_p3 = pnand %p836_p0, %p835_p13  ;;  %p843_p11 = scmp.lt.u32.totalorder %s834_s12, %s1099_s8 }
  0x4c   : > { %p842_p12 = por %p841_p9, %p840_p7 }
  0x4d   : > { %p838_p5 = pneg %p837_p3 }
  0x4e   : > { %p844_p1 = por %p843_p11, %p842_p12 }
  0x50   : > { %p845_p2 = pnand %p844_p1, %p838_p5 }
  0x52   : > { %848 = shalt.err (!%p845_p2)
}
  0x53   : > { %s849_s30 = scalar_lea.vmem %s1101_s10, 64  ;;  %s940_s15 = smov [#allocation2]  }
  0x54   : > { %p850_p6 = scmp.ne.s32.totalorder %s1101_s10, %s849_s30  ;;  %s854_s16 = sshll.u32 %s940_s15, 4  ;;  %s855_s16 = int_to_ptr.vmem [resolvable:$false] %s854_s16 }
  0x55   : > { %s856_s9 = scalar_lea.vmem %s855_s16, 128  ;;  %p857_p3 = scmp.lt.s32.totalorder %s1101_s10, %s855_s16 }
  0x56   : > { %p852_p8 = pnand %p850_p6, %p836_p0  ;;  %p858_p7 = scmp.lt.s32.totalorder %s856_s9, %s849_s30 }
  0x58   : > { %p853_p13 = pneg %p852_p8  ;;  %p859_p9 = por %p858_p7, %p857_p3 }
  0x5a   : > { %p860_p12 = pnand %p859_p9, %p853_p13 }
  0x5c   : > { %863 = shalt.err (!%p860_p12)
}
  0x5d   : > { %713 = dma.hbm_to_vmem [thread:$0]  (!%p1103_p10), %s1099_s8, 64, %s1101_s10, %s209_s28  }
  0x5e   : > { %p1220_p5 = scmp.ne.s32.totalorder %s1215_s26, 0 }
  0x5f   : > { %s1135_s12 = sand.u32 (!%p1220_p5), 1, %s926_s19   ;;  %p1221_p0 = scmp.ne.s32.totalorder (!%p1220_p5), %s1213_s24, 0 }
  0x60   : > { %228 = sbr.rel (%p1220_p5) target bundleno = 587 (0x24b), region = 40  ;;  %s607_s13 = sshll.u32 (!%p1220_p5), %s1135_s12, 2 }
  0x61   : > { %s231_s29 = scalar_lea.sflag (!%p1220_p5), [#allocation3], %s1135_s12  ;;  %s1139_s17 = scalar_lea.vmem (!%p1220_p5), [#allocation2], %s607_s13 }
  0x67   : > { %909 = dma.done.wait (%p1221_p0), %s231_s29, 64  }
  0x68   : > { %911 = vsyncadd (%p1221_p0), %s231_s29, 4294967232  ;;  %p1222_p10 = scmp.eq.s32.totalorder %s995_s22, 0 }
  0x6a   : > { %913 = dma.done.wait (%p1222_p10), [#allocation6], 2048   ;;  %p1223_p11 = pmov %p1222_p10 }
  0x6b   : > { %v941_v0 = vmov 0.0   ;;  %vm942_vm0 = vmmov 0   ;;  %v762_v1 = vld [vmem:[#allocation5] sm:$0xff]   ;;  %v763_v2 = vld [vmem:[#allocation5 + $0x8] sm:$0xff]   ;;  %v764_v3 = vld [vmem:[#allocation5 + $0x10] sm:$0xff]   ;;  %s610_s8 = sshll.u32 %s1135_s12, 3 }
  0x6c   : > { %915 = vsyncadd (%p1223_p11), [#allocation6], 4294965248  ;;  %651 = vmatprep.subr.bf16.mxu0 %v941_v0  ;;  %667 = vmatprep.mubr.msk.bf16.mxu0 %vm942_vm0, %v941_v0  ;;  %v770_v4 = vld [vmem:[#allocation7] sm:$0xff]   ;;  %v765_v5 = vld [vmem:[#allocation5 + $0x18] sm:$0xff]   ;;  %s630_s28 = sshll.u32 %s995_s22, 7  ;;  %s268_s7 = scalar_lea.vmem [#allocation8], %s610_s8 }
  0x6d   : > { %671 = vmatprep.subr.bf16.mxu1 %v941_v0  ;;  %687 = vmatprep.mubr.msk.bf16.mxu1 %vm942_vm0, %v941_v0  ;;  %v771_v6 = vld [vmem:[#allocation7 + $0x8] sm:$0xff]   ;;  %v766_v7 = vld [vmem:[#allocation5 + $0x20] sm:$0xff]   ;;  %v772_v8 = vld [vmem:[#allocation7 + $0x10] sm:$0xff]   ;;  %s510_s6 = sshll.u32 %s268_s7, 4  ;;  %s1161_s16 = scalar_lea.hbm %s1209_s5, %s630_s28  ;;  %s1163_s6 = int_to_ptr.vmem [resolvable:$true] %s510_s6 }
  0x6e   : > { %652 = vmatpush3.bf16.msra.mxu0 %v762_v1  ;;  %672 = vmatpush3.bf16.msra.mxu1 %v770_v4  ;;  %v767_v9 = vld [vmem:[#allocation5 + $0x28] sm:$0xff]   ;;  %v773_v10 = vld [vmem:[#allocation7 + $0x18] sm:$0xff]   ;;  %v768_v11 = vld [vmem:[#allocation5 + $0x30] sm:$0xff]   ;;  %s497_s9 = scalar_lea.sflag [#allocation4], %s1135_s12  ;;  %s864_s22 = scalar_lea.vmem %s1163_s6, 128 }
  0x6f   : > { %653 = vmatprep.subr.bf16.mxu0 %v941_v0  ;;  %673 = vmatprep.subr.bf16.mxu1 %v941_v0  ;;  %v774_v12 = vld [vmem:[#allocation7 + $0x20] sm:$0xff]   ;;  %v769_v13 = vld [vmem:[#allocation5 + $0x38] sm:$0xff]   ;;  %v775_v14 = vld [vmem:[#allocation7 + $0x28] sm:$0xff]   ;;  %p865_p1 = scmp.ne.s32.totalorder %s1163_s6, %s864_s22  ;;  %s943_s13 = smov [#allocation8]  }
  0x70   : > { %v270_v15 = vld [vmem:[%s1139_s17] sm:$0xf]  ;;  %v776_v16 = vld [vmem:[#allocation7 + $0x30] sm:$0xff]   ;;  %s868_s29 = sshll.u32 %s943_s13, 4  ;;  %s869_s29 = int_to_ptr.vmem [resolvable:$false] %s868_s29 }
  0x71   : > { %v777_v17 = vld [vmem:[#allocation7 + $0x38] sm:$0xff]   ;;  %p866_p2 = pnand %p865_p1, %p1086_p4  ;;  %s870_s17 = scalar_lea.vmem %s869_s29, 256 }
  0x72   : > { %654 = vmatpush3.bf16.msra.mxu0 %v763_v2  ;;  %674 = vmatpush3.bf16.msra.mxu1 %v771_v6  ;;  %v611_v18 = vld [vmem:[%s1206_s2] ss:$0 sm:$0xff]  ;;  %p871_p8 = scmp.lt.s32.totalorder %s1163_s6, %s869_s29  ;;  %p872_p13 = scmp.lt.s32.totalorder %s870_s17, %s864_s22 }
  0x73   : > { %655 = vmatprep.subr.bf16.mxu0 %v941_v0  ;;  %675 = vmatprep.subr.bf16.mxu1 %v941_v0  ;;  %v620_v26 = vld [vmem:[%s1208_s4] ss:$0 sm:$0xff]  ;;  %p867_p6 = pneg %p866_p2 }
  0x74   : > { %p873_p3 = por %p872_p13, %p871_p8 }
  0x76   : > { %656 = vmatpush3.bf16.msra.mxu0 %v764_v3  ;;  %676 = vmatpush3.bf16.msra.mxu1 %v772_v8  ;;  %p874_p7 = pnand %p873_p3, %p867_p6 }
  0x77   : > { %657 = vmatprep.subr.bf16.mxu0 %v941_v0  ;;  %677 = vmatprep.subr.bf16.mxu1 %v941_v0 }
  0x7a   : > { %658 = vmatpush3.bf16.msra.mxu0 %v765_v5  ;;  %678 = vmatpush3.bf16.msra.mxu1 %v773_v10 }
  0x7b   : > { %659 = vmatprep.subr.bf16.mxu0 %v941_v0  ;;  %679 = vmatprep.subr.bf16.mxu1 %v941_v0 }
  0x7e   : > { %660 = vmatpush3.bf16.msra.mxu0 %v766_v7  ;;  %680 = vmatpush3.bf16.msra.mxu1 %v774_v12 }
  0x7f   : > { %661 = vmatprep.subr.bf16.mxu0 %v941_v0  ;;  %681 = vmatprep.subr.bf16.mxu1 %v941_v0 }
  0x82   : > { %662 = vmatpush3.bf16.msra.mxu0 %v767_v9  ;;  %682 = vmatpush3.bf16.msra.mxu1 %v775_v14 }
  0x83   : > { %663 = vmatprep.subr.bf16.mxu0 %v941_v0  ;;  %683 = vmatprep.subr.bf16.mxu1 %v941_v0 }
  0x86   : > { %664 = vmatpush3.bf16.msra.mxu0 %v768_v11  ;;  %684 = vmatpush3.bf16.msra.mxu1 %v776_v16 }
  0x87   : > { %665 = vmatprep.subr.bf16.mxu0 %v941_v0  ;;  %685 = vmatprep.subr.bf16.mxu1 %v941_v0 }
  0x8a   : > { %666 = vmatpush3.bf16.msra.mxu0 %v769_v13  ;;  %686 = vmatpush3.bf16.msra.mxu1 %v777_v17 }
  0x8d   : > { %668 = vmatmul.mubr.bf16.vlgmr.msra.gmra.mrb[0].mxu0 %v270_v15 }
 0x160   : > { %v376_v19 = vpop.f32.mrb[0].mxu0 }
 0x161   : > { %v377_v20 = vadd.f32 %v611_v18, %v376_v19  ;;  %v669_v21 = vpop.f32.mrb[1].mxu0 }
 0x162   : > { %v379_v22 = vpop.f32.mrb[2].mxu0 }
 0x163   : > { %v382_v23 = vmax.f32 %v377_v20, 0.0  ;;  %v670_v24 = vpop.f32.mrb[3].mxu0 }
 0x165   : > { %v383_v25 = vpack.c.bf16 %v382_v23, %v382_v23 }
 0x167   : > { %688 = vmatmul.mubr.bf16.vlgmr.msra.gmra.mrb[0].mxu1 %v383_v25 }
 0x23a   : > { %v489_v27 = vpop.f32.mrb[0].mxu1 }
 0x23b   : > { %v490_v28 = vadd.f32 %v620_v26, %v489_v27  ;;  %v689_v29 = vpop.f32.mrb[1].mxu1 }
 0x23c   : > { %v492_v30 = vpop.f32.mrb[2].mxu1 }
 0x23d   : > { %495 = vst [vmem:[%s268_s7] sm:$0xff] %v490_v28  ;;  %v690_v31 = vpop.f32.mrb[3].mxu1 }
 0x23e   : > { %877 = shalt.err (!%p874_p7)
}
 0x23f   : > { %s878_s12 = scalar_lea.hbm %s1161_s16, 128  ;;  %s882_s8 = scalar_lea.hbm %s1209_s5, 512 }
 0x240   : > { %p879_p9 = scmp.ne.s32.totalorder %s1161_s16, %s878_s12  ;;  %p883_p0 = scmp.lt.u32.totalorder %s1161_s16, %s1209_s5 }
 0x241   : > { %p884_p10 = scmp.lt.u32.totalorder %s882_s8, %s878_s12  ;;  %p886_p1 = scmp.lt.u32.totalorder %s878_s12, %s1161_s16 }
 0x242   : > { %p880_p12 = pnand %p879_p9, %p1086_p4 }
 0x243   : > { %p885_p11 = por %p884_p10, %p883_p0 }
 0x244   : > { %p881_p5 = pneg %p880_p12 }
 0x245   : > { %p887_p2 = por %p886_p1, %p885_p11 }
 0x247   : > { %p888_p6 = pnand %p887_p2, %p881_p5 }
 0x249   : > { %891 = shalt.err (!%p888_p6)
}
 0x24a   : > { %701 = dma.vmem_to_hbm [thread:$0]  (%p1086_p4), %s1163_s6, 128, %s1161_s16, %s497_s9  }
 0x24b PF: > { %p723_p8 = scmp.ge.s32.totalorder %s934_s21, 2  ;;  %s522_s28 = sand.u32 1, %s922_s18  }
 0x24c   : > { %p1224_p13 = scmp.ne.s32.totalorder %s1214_s25, 0  ;;  %s523_s7 = scalar_lea.sflag [#allocation4], %s522_s28 }
 0x24e   : > { %p715_p3 = pnand %p723_p8, %p1224_p13 }
 0x250   : > { %917 = dma.done.wait (!%p715_p3), %s523_s7, 128  }
 0x251   : > { %919 = vsyncadd (!%p715_p3), %s523_s7, 4294967168  ;;  %p19_p7 = scmp.ge.s32.totalorder %s1076_s14, 6   ;;  %s1225_s18 = smov %s926_s19 }
 0x252   : > { %s1226_s19 = smov %s930_s20  ;;  %s1227_s20 = smov %s1092_s27 }
 0x253   : > { %s1228_s21 = smov %s1076_s14  ;;  %21 = sbr.rel (!%p19_p7) target bundleno = 6 (0x6), region = 93 }
 0x25a   :  { %528 = vsyncpa [#allocation3], 1 }
 0x25b   :  { %530 = vsyncpa [#allocation3 + $0x1], 1 }
 0x25c   :  { %531 = vsyncpa [#allocation6], 1 }
 0x25d   :  { %532 = vsyncpa [#allocation4], 1 }
 0x25e   :  { %534 = vsyncpa [#allocation4 + $0x1], 1 }

</bundles_post_ra>
